<compile_context>
chip_gen: v5e
topology: v5e:2x2
jax: 0.10.0
libtpu: 0.0.40
codegen_flags: <defaults>
</compile_context>

<pallas_src>
import functools

import jax
import jax.numpy as jnp
from jax.experimental import pallas as pl
from jax.experimental.pallas import tpu as pltpu


def _focal_loss_kernel(x_ref, t_ref, o_ref, acc_ref, *, gamma, total_n, blk_n):
    i = pl.program_id(0)

    @pl.when(i == 0)
    def _():
        acc_ref[...] = jnp.zeros_like(acc_ref)

    x = x_ref[...].astype(jnp.float32)      # (blk_n, C) logits, f32 in vregs
    tgt = t_ref[...]                        # (blk_n, 1) int32 targets
    n, c = x.shape

    # Numerically stable log-sum-exp over the class (lane) axis.
    m = jnp.max(x, axis=-1, keepdims=True)                      # (blk_n, 1)
    z = x - m                                                   # (blk_n, C)
    lse = jnp.log(jnp.sum(jnp.exp(z), axis=-1, keepdims=True))  # (blk_n, 1)

    # Gather z at the target column via a one-hot masked sum (no scatter /
    # gather, no full (N, C) prob/focal temporaries).
    col = jax.lax.broadcasted_iota(jnp.int32, (n, c), 1)
    z_t = jnp.sum(jnp.where(col == tgt, z, 0.0),
                  axis=-1, keepdims=True)                       # (blk_n, 1)

    logp_t = z_t - lse                      # (blk_n, 1) = log p_target
    p_t = jnp.exp(logp_t)                   # (blk_n, 1) = p_target
    one_minus_p = 1.0 - p_t

    ig = int(gamma)
    if float(gamma) == float(ig) and 0 <= ig <= 8:
        # Integer gamma (the default 2.0): repeated multiplies on the VPU.
        w = jnp.ones_like(one_minus_p)
        for _ in range(ig):
            w = w * one_minus_p
    else:
        w = one_minus_p ** jnp.float32(gamma)   # only O(N) elements

    per_row = w * logp_t                    # (blk_n, 1)

    # Mask rows of a partial final block (the padded region is undefined).
    row = jax.lax.broadcasted_iota(jnp.int32, (n, 1), 0) + i * blk_n
    per_row = jnp.where(row < total_n, per_row, 0.0)

    acc_ref[...] += jnp.sum(per_row, keepdims=True)

    @pl.when(i == pl.num_programs(0) - 1)
    def _():
        # nll_loss(weight=None, reduction='mean'): mean over ALL N samples.
        o_ref[...] = -acc_ref[...] / jnp.float32(total_n)


def focal_loss(input_tensor, target_tensor, gamma=2.0, block_rows=1024):
    """Pallas equivalent of FocalLoss(weight=None, gamma, reduction='mean').

    input_tensor: (N, C) logits (any float dtype; upcast to f32 in-kernel)
    target_tensor: (N,) int class indices
    returns: scalar float32 loss
    """
    n, c = input_tensor.shape
    tgt2d = target_tensor.astype(jnp.int32).reshape(n, 1)

    # Row-block size: full array if it fits, otherwise a multiple of 8
    # (sublane tiling) capped so tile + double-buffering stays well inside the
    # scoped VMEM limit on all generations (incl. v7x's 64 MiB).
    if n <= block_rows:
        blk_n = n
    else:
        blk_n = max(8, (block_rows // 8) * 8)
    grid = (pl.cdiv(n, blk_n),)

    out = pl.pallas_call(
        functools.partial(
            _focal_loss_kernel, gamma=gamma, total_n=n, blk_n=blk_n),
        out_shape=jax.ShapeDtypeStruct((1, 1), jnp.float32),
        grid_spec=pltpu.PrefetchScalarGridSpec(
            num_scalar_prefetch=0,
            grid=grid,
            in_specs=[
                pl.BlockSpec((blk_n, c), lambda i: (i, 0)),
                pl.BlockSpec((blk_n, 1), lambda i: (i, 0)),
            ],
            out_specs=pl.BlockSpec((1, 1), lambda i: (0, 0)),
            scratch_shapes=[pltpu.VMEM((1, 1), jnp.float32)],
        ),
        compiler_params=pltpu.CompilerParams(
            dimension_semantics=("arbitrary",)),  # reduction into one scalar
    )(input_tensor, tgt2d)
    return out[0, 0]


def focal_loss_ref(input_tensor, target_tensor, gamma=2.0):
    """Pure-JAX reference matching the PyTorch module semantics."""
    log_prob = jax.nn.log_softmax(input_tensor.astype(jnp.float32), axis=-1)
    prob = jnp.exp(log_prob)
    focal = ((1.0 - prob) ** gamma) * log_prob
    picked = jnp.take_along_axis(
        focal, target_tensor.astype(jnp.int32)[:, None], axis=-1
    )[:, 0]
    return -jnp.mean(picked)


if __name__ == "__main__":
    key = jax.random.PRNGKey(0)
    k1, k2, k3, k4 = jax.random.split(key, 4)

    # Case 1: small single-block shape (8 samples, 16 classes), f32 logits.
    N1, C1 = 8, 16
    logits1 = jax.random.normal(k1, (N1, C1), dtype=jnp.float32)
    targets1 = jax.random.randint(k2, (N1,), 0, C1, dtype=jnp.int32)
    loss1 = focal_loss(logits1, targets1, gamma=2.0)
    jax.block_until_ready(loss1)
    ref1 = focal_loss_ref(logits1, targets1, gamma=2.0)
    assert jnp.allclose(loss1, ref1, atol=1e-5, rtol=1e-5), (loss1, ref1)

    # Case 2: multi-block grid with a partial final block (N=20, block=8) and
    # bf16 logits passed in their native dtype (upcast happens in-kernel).
    N2, C2 = 20, 128
    logits2 = jax.random.normal(k3, (N2, C2), dtype=jnp.float32).astype(
        jnp.bfloat16)
    targets2 = jax.random.randint(k4, (N2,), 0, C2, dtype=jnp.int32)
    loss2 = focal_loss(logits2, targets2, gamma=2.0, block_rows=8)
    jax.block_until_ready(loss2)
    ref2 = focal_loss_ref(logits2, targets2, gamma=2.0)
    assert jnp.allclose(loss2, ref2, atol=1e-5, rtol=1e-5), (loss2, ref2)

    print("KERNEL_OK")
</pallas_src>

<mosaic_0001>
module attributes {stable_mosaic.version = 11 : i64} {
  func.func @_focal_loss_kernel(%arg0: i32, %arg1: memref<8x16xf32, #tpu.memory_space<vmem>>, %arg2: memref<8x1xi32, #tpu.memory_space<vmem>>, %arg3: memref<1x1xf32, #tpu.memory_space<vmem>>, %arg4: memref<1x1xf32, #tpu.memory_space<vmem>>) attributes {dimension_semantics = [#tpu.dimension_semantics<arbitrary>], iteration_bounds = array<i64: 1>, scalar_prefetch = 0 : i64, scratch_operands = 1 : i64, tpu.core_type = #tpu.core_type<tc>, window_params = [{transform_indices = @transform_0, window_bounds = array<i64: 8, 16>}, {transform_indices = @transform_1, window_bounds = array<i64: 8, 1>}, {pipeline_mode = #tpu.pipeline_mode<synchronous>, transform_indices = @transform_2, window_bounds = array<i64: 1, 1>}]} {
    %c0_i32 = arith.constant 0 : i32
    %0 = arith.cmpi eq, %arg0, %c0_i32 : i32
    %1 = arith.extui %0 : i1 to i32
    %c0_i32_0 = arith.constant 0 : i32
    %2 = arith.cmpi ne, %1, %c0_i32_0 : i32
    scf.if %2 {
      %cst_18 = arith.constant 0.000000e+00 : f32
      %47 = vector.broadcast %cst_18 : f32 to vector<1x1xf32>
      %c0_19 = arith.constant 0 : index
      %c0_20 = arith.constant 0 : index
      %48 = vector.load %arg4[%c0_19, %c0_20] : memref<1x1xf32, #tpu.memory_space<vmem>>, vector<1x1xf32>
      tpu.vector_store %arg4[%c0_19, %c0_20], %47 {strides = array<i32>} : memref<1x1xf32, #tpu.memory_space<vmem>>, vector<1x1xf32>,
    } else {
    }
    %c0 = arith.constant 0 : index
    %c0_1 = arith.constant 0 : index
    %3 = vector.load %arg1[%c0, %c0_1] : memref<8x16xf32, #tpu.memory_space<vmem>>, vector<8x16xf32>
    %c0_2 = arith.constant 0 : index
    %c0_3 = arith.constant 0 : index
    %4 = vector.load %arg2[%c0_2, %c0_3] : memref<8x1xi32, #tpu.memory_space<vmem>>, vector<8x1xi32>
    %cst = arith.constant dense<0xFF800000> : vector<8xf32>
    %5 = vector.multi_reduction <maximumf>, %3, %cst [1] : vector<8x16xf32> to vector<8xf32>
    %6 = vector.shape_cast %5 : vector<8xf32> to vector<8x1xf32>
    %7 = vector.broadcast %6 : vector<8x1xf32> to vector<8x16xf32>
    %8 = arith.subf %3, %7 : vector<8x16xf32>
    %9 = math.exp %8 : vector<8x16xf32>
    %cst_4 = arith.constant dense<0.000000e+00> : vector<8xf32>
    %10 = vector.multi_reduction <add>, %9, %cst_4 [1] : vector<8x16xf32> to vector<8xf32>
    %11 = vector.shape_cast %10 : vector<8xf32> to vector<8x1xf32>
    %12 = math.log %11 : vector<8x1xf32>
    %13 = tpu.iota {dimensions = array<i32: 1>} : vector<8x16xi32>
    %14 = vector.broadcast %4 : vector<8x1xi32> to vector<8x16xi32>
    %15 = arith.cmpi eq, %13, %14 : vector<8x16xi32>
    %cst_5 = arith.constant 0.000000e+00 : f32
    %16 = vector.broadcast %cst_5 : f32 to vector<8x16xf32>
    %17 = arith.select %15, %8, %16 : vector<8x16xi1>, vector<8x16xf32>
    %cst_6 = arith.constant dense<0.000000e+00> : vector<8xf32>
    %18 = vector.multi_reduction <add>, %17, %cst_6 [1] : vector<8x16xf32> to vector<8xf32>
    %19 = vector.shape_cast %18 : vector<8xf32> to vector<8x1xf32>
    %20 = arith.subf %19, %12 : vector<8x1xf32>
    %21 = math.exp %20 : vector<8x1xf32>
    %cst_7 = arith.constant 1.000000e+00 : f32
    %22 = vector.broadcast %cst_7 : f32 to vector<8x1xf32>
    %23 = arith.subf %22, %21 : vector<8x1xf32>
    %cst_8 = arith.constant 1.000000e+00 : f32
    %24 = vector.broadcast %cst_8 : f32 to vector<8x1xf32>
    %25 = arith.mulf %24, %23 : vector<8x1xf32>
    %26 = arith.mulf %25, %23 : vector<8x1xf32>
    %27 = arith.mulf %26, %20 : vector<8x1xf32>
    %28 = tpu.iota {dimensions = array<i32: 0>} : vector<8x1xi32>
    %c8_i32 = arith.constant 8 : i32
    %29 = arith.muli %arg0, %c8_i32 : i32
    %30 = vector.broadcast %29 : i32 to vector<8x1xi32>
    %31 = arith.addi %28, %30 : vector<8x1xi32>
    %c8_i32_9 = arith.constant 8 : i32
    %32 = vector.broadcast %c8_i32_9 : i32 to vector<8x1xi32>
    %33 = arith.cmpi slt, %31, %32 : vector<8x1xi32>
    %cst_10 = arith.constant 0.000000e+00 : f32
    %34 = vector.broadcast %cst_10 : f32 to vector<8x1xf32>
    %35 = arith.select %33, %27, %34 : vector<8x1xi1>, vector<8x1xf32>
    %c0_11 = arith.constant 0 : index
    %c0_12 = arith.constant 0 : index
    %36 = vector.load %arg4[%c0_11, %c0_12] : memref<1x1xf32, #tpu.memory_space<vmem>>, vector<1x1xf32>
    %37 = vector.shape_cast %35 : vector<8x1xf32> to vector<1x8x1xf32>
    %cst_13 = arith.constant dense<0.000000e+00> : vector<1xf32>
    %38 = vector.multi_reduction <add>, %37, %cst_13 [1, 2] : vector<1x8x1xf32> to vector<1xf32>
    %39 = vector.shape_cast %38 : vector<1xf32> to vector<1x1x1xf32>
    %40 = vector.extract %39[0, 0, 0] : f32 from vector<1x1x1xf32>
    %41 = vector.broadcast %40 : f32 to vector<1x1xf32>
    %42 = arith.addf %36, %41 : vector<1x1xf32>
    %c0_14 = arith.constant 0 : index
    %c0_15 = arith.constant 0 : index
    %43 = vector.load %arg4[%c0_14, %c0_15] : memref<1x1xf32, #tpu.memory_space<vmem>>, vector<1x1xf32>
    tpu.vector_store %arg4[%c0_14, %c0_15], %42 {strides = array<i32>} : memref<1x1xf32, #tpu.memory_space<vmem>>, vector<1x1xf32>,
    %c0_i32_16 = arith.constant 0 : i32
    %44 = arith.cmpi eq, %arg0, %c0_i32_16 : i32
    %45 = arith.extui %44 : i1 to i32
    %c0_i32_17 = arith.constant 0 : i32
    %46 = arith.cmpi ne, %45, %c0_i32_17 : i32
    scf.if %46 {
      %c0_18 = arith.constant 0 : index
      %c0_19 = arith.constant 0 : index
      %47 = vector.load %arg4[%c0_18, %c0_19] : memref<1x1xf32, #tpu.memory_space<vmem>>, vector<1x1xf32>
      %cst_20 = arith.constant 0.000000e+00 : f32
      %48 = vector.broadcast %cst_20 : f32 to vector<1x1xf32>
      %49 = arith.subf %48, %47 : vector<1x1xf32>
      %cst_21 = arith.constant 8.000000e+00 : f32
      %50 = vector.broadcast %cst_21 : f32 to vector<1x1xf32>
      %51 = arith.divf %49, %50 : vector<1x1xf32>
      %c0_22 = arith.constant 0 : index
      %c0_23 = arith.constant 0 : index
      %52 = vector.load %arg3[%c0_22, %c0_23] : memref<1x1xf32, #tpu.memory_space<vmem>>, vector<1x1xf32>
      tpu.vector_store %arg3[%c0_22, %c0_23], %51 {strides = array<i32>} : memref<1x1xf32, #tpu.memory_space<vmem>>, vector<1x1xf32>,
    } else {
    }
    return
  }
  func.func @transform_0(%arg0: i32) -> (i32, i32) {
    %c0_i32 = arith.constant 0 : i32
    %c0_i32_0 = arith.constant 0 : i32
    return %arg0, %c0_i32 : i32, i32
  }
  func.func @transform_1(%arg0: i32) -> (i32, i32) {
    %c0_i32 = arith.constant 0 : i32
    %c0_i32_0 = arith.constant 0 : i32
    return %arg0, %c0_i32 : i32, i32
  }
  func.func @transform_2(%arg0: i32) -> (i32, i32) {
    %c0_i32 = arith.constant 0 : i32
    %c0_i32_0 = arith.constant 0 : i32
    %c0_i32_1 = arith.constant 0 : i32
    return %c0_i32, %c0_i32_0 : i32, i32
  }
}

</mosaic_0001>

<bundles_post_ra>
// kernel: tpu_custom_call.1
= control target key start
LH: loop header
LB: loop body
LE: loop exit
PB: predicated region body
PF: predicated region fallthrough
CT: control target
= control target key end

     0   :  { %vm20_vm0 = vcmask 130048   ;;  %s176_s0 = inlined_call_operand.vmem [shape: f32[8,16], index: 0, kind: input, shape index: {}]   ;;  %s177_s1 = inlined_call_operand.vmem [shape: s32[8,1], index: 1, kind: input, shape index: {}]   ;;  %s178_s2 = inlined_call_operand.hbm [shape: f32[1,1], index: 2, kind: output, shape index: {}]  }
   0x1   :  { %v18_v0 = vld [vmem:[%s176_s0] sm:$0xff] }
   0x2   :  { %7 = vsyncpa [#allocation4], 0  ;;  %v21_v1 = vsel %vm20_vm0, %v18_v0, -inf  ;;  %v142_v2 = vmov 0   ;;  %v19_v3 = vld [vmem:[%s177_s1] sm:$0xff]  ;;  %v32_v9 = vlaneseq  ;;  %vm56_vm2 = vcmask 7168  }
   0x3   :  { %107 = vset.pattern.permute.xlu0 %v142_v2  ;;  %vm16_vm3 = vcmask 0   ;;  %v143_v25 = vmov 0.0   ;;  %v144_v33 = vmov 8.0   ;;  %s145_s1 = smov [#allocation3]   ;;  %s92_s16 = sshll.u32 %s178_s2, 4  ;;  %s93_s16 = int_to_ptr.hbm [resolvable:$true] %s92_s16 }
   0x4   :  { %22 = vmax.xlane.f32.xlu0 %v21_v1  ;;  %v33_v10 = vand.u32 127, %v32_v9  ;;  %17 = vst.msk [vmem:[#allocation2] sm:$0x1] %vm16_vm3, %v143_v25  ;;  %s90_s13 = sshll.u32 %s145_s1, 4  ;;  %s91_s13 = int_to_ptr.vmem [resolvable:$true] %s90_s13 }
   0xb   :  { %v55_v36 = vld [vmem:[#allocation2] sm:$0x1] }
  0x18   :  { %35 = vperm.xlu0 %107, %v19_v3  }
  0x77   :  { %v23_v4 = vpop.xlane.xlu0 %22 }
  0x78   :  { %v24_v5 = vsub.f32 %v18_v0, %v23_v4 }
  0x7a   :  { %v25_v6 = vmul.f32 1.442695, %v24_v5 }
  0x7c   :  { %108 = vpow2.f32 %v25_v6 }
  0x82   :  { %v109_v7 = vpop.eup %108 }
  0x83   :  { %v27_v8 = vsel %vm20_vm0, %v109_v7, 0.0 }
  0x84   :  { %28 = vadd.xlane.f32.xlu1 %v27_v8 }
  0x8a   :  { %v36_v11 = vpop.permute.xlu0 %35 }
  0x8b   :  { %vm37_vm1 = vcmp.eq.s32.totalorder %v33_v10, %v36_v11 }
  0x8c   :  { %v38_v12 = vsel %vm37_vm1, %v24_v5, 0.0 }
  0x8d   :  { %v39_v13 = vsel %vm20_vm0, %v38_v12, 0.0 }
  0x8e   :  { %40 = vadd.xlane.f32.xlu1 %v39_v13 }
  0xf7   :  { %v29_v14 = vpop.xlane.xlu1 %28 }
  0xf8   :  { %110 = vlog2.f32 %v29_v14 }
  0xfe   :  { %v111_v15 = vpop.eup %110 }
  0xff   :  { %v31_v16 = vmul.f32 0.6931472, %v111_v15 }
 0x101   :  { %v41_v17 = vpop.xlane.xlu1 %40 }
 0x102   :  { %v42_v18 = vsub.f32 %v41_v17, %v31_v16 }
 0x104   :  { %v43_v19 = vmul.f32 1.442695, %v42_v18 }
 0x106   :  { %112 = vpow2.f32 %v43_v19 }
 0x107   :  { %114 = vrcp.f32 %v144_v33 }
 0x10c   :  { %v113_v20 = vpop.eup %112 }
 0x10d   :  { %v45_v21 = vsub.f32 1.0, %v113_v20  ;;  %v115_v34 = vpop.eup %114 }
 0x10e   :  { %v77_v35 = vmul.f32 8.0, %v115_v34  ;;  %vm81_vm4 = vweird.f32 %v115_v34 }
 0x10f   :  { %v46_v22 = vmul.f32 %v45_v21, %v45_v21 }
 0x110   :  { %v78_v37 = vsub.f32 1.0, %v77_v35 }
 0x111   :  { %v47_v23 = vmul.f32 %v46_v22, %v42_v18 }
 0x112   :  { %v79_v40 = vmul.f32 %v115_v34, %v78_v37 }
 0x113   :  { %v57_v24 = vsel %vm56_vm2, %v47_v23, 0.0 }
 0x114   :  { %58 = vadd.xlane.f32.xlu2 %v57_v24  ;;  %v80_v41 = vadd.f32 %v115_v34, %v79_v40 }
 0x116   :  { %v82_v43 = vsel %vm81_vm4, %v115_v34, %v80_v41 }
 0x187   :  { %v59_v26 = vpop.xlane.xlu2 %58 }
 0x188   :  { %v60_v27 = vrot.slane %v59_v26, 4 }
 0x18a   :  { %v61_v28 = vadd.f32 %v60_v27, %v59_v26 }
 0x18c   :  { %v62_v29 = vrot.slane %v61_v28, 2 }
 0x18e   :  { %v63_v30 = vadd.f32 %v62_v29, %v61_v28 }
 0x190   :  { %v64_v31 = vrot.slane %v63_v30, 1 }
 0x192   :  { %v65_v32 = vadd.f32 %v64_v31, %v63_v30 }
 0x194   :  { %101 = vpush %v65_v32 }
 0x1c5   :  { %s102_s0 = spop %101 }
 0x1c6   :  { %v67_v38 = vstv %s102_s0 }
 0x1c7   :  { %v68_v39 = vadd.f32 %v67_v38, %v55_v36 }
 0x1c9   :  { %70 = vst.msk [vmem:[#allocation2] sm:$0x1] %vm16_vm3, %v68_v39 }
 0x1d0   :  { %v74_v42 = vld [vmem:[#allocation2] sm:$0x1] }
 0x1d1   :  { %v75_v44 = vsub.f32 0.0, %v74_v42 }
 0x1d3   :  { %v83_v45 = vmul.f32 %v82_v43, %v75_v44 }
 0x1d5   :  { %84 = vst.msk [vmem:[#allocation3] sm:$0x1] %vm16_vm3, %v83_v45 }
 0x1d6   :  { %95 = dma.vmem_to_hbm [thread:$0]  %s91_s13, 16, %s93_s16, [#allocation4]  }
 0x1d7   :  { %140 = dma.done.wait [#allocation4], 16  }
 0x1d8   :  { %141 = vsyncadd [#allocation4], 4294967280 }
 0x1d9   :  { %100 = vsyncpa [#allocation4], 1 }

</bundles_post_ra>
